<compile_context>
chip_gen: v6e
topology: v6e:2x2x1
jax: 0.10.0
libtpu: 0.0.40
codegen_flags: <defaults>
</compile_context>

<pallas_src>
import jax
import jax.numpy as jnp
from jax.experimental import pallas as pl
from jax.experimental.pallas import tpu as pltpu

HIDDEN = 64


def _value_mlp_kernel(x_ref, w1_ref, b1_ref, w2_ref, b2_ref, w3r_ref, b3_ref, o_ref):
    # Layer 1: Linear(state_dim, 64) + ReLU   (bf16 MXU matmul, f32 accumulate)
    h1 = jnp.dot(x_ref[...], w1_ref[...], preferred_element_type=jnp.float32)
    h1 = jnp.maximum(h1 + b1_ref[...], 0.0)

    # Layer 2: Linear(64, 64) + ReLU          (bf16 MXU matmul, f32 accumulate)
    h2 = jnp.dot(h1.astype(jnp.bfloat16), w2_ref[...],
                 preferred_element_type=jnp.float32)
    h2 = jnp.maximum(h2 + b2_ref[...], 0.0)

    # Layer 3: Linear(64, 1) as VPU multiply + cross-lane reduction (N=1 matmul
    # would waste the MXU).  b3 is a scalar read from SMEM.
    out = jnp.sum(h2 * w3r_ref[...], axis=-1, keepdims=True) + b3_ref[0, 0]
    o_ref[...] = out.astype(o_ref.dtype)


def value_model_forward(states, params, *, tb=512):
    """states: (B, state_dim) float32 -> (B, 1) float32."""
    w1, b1, w2, b2, w3, b3 = params
    B, state_dim = states.shape

    # bf16 operands for the MXU; biases / reduction row stay f32 for the VPU path.
    x_bf16 = states.astype(jnp.bfloat16)
    w1_bf16 = w1.astype(jnp.bfloat16)
    w2_bf16 = w2.astype(jnp.bfloat16)
    w3_row = w3.reshape(1, HIDDEN)  # (64, 1) -> (1, 64) for the lane reduction

    # Batch tile: full batch when small, otherwise a fixed tile (multiple of 16,
    # so bf16 sublane packing is happy); weights stay resident across steps.
    TB = B if B <= tb else tb
    grid = (pl.cdiv(B, TB),)

    resident = lambda arr: pl.BlockSpec(arr.shape, lambda i: (0, 0))

    flops = 2 * B * (state_dim * HIDDEN + HIDDEN * HIDDEN + HIDDEN)
    bytes_accessed = (
        B * state_dim * 2                       # bf16 activations in
        + B * 4                                 # f32 output
        + (w1_bf16.size + w2_bf16.size) * 2     # bf16 weights
        + (b1.size + b2.size + w3_row.size + b3.size) * 4
    )

    return pl.pallas_call(
        _value_mlp_kernel,
        out_shape=jax.ShapeDtypeStruct((B, 1), jnp.float32),
        grid_spec=pltpu.PrefetchScalarGridSpec(
            num_scalar_prefetch=0,
            grid=grid,
            in_specs=[
                pl.BlockSpec((TB, state_dim), lambda i: (i, 0)),    # x tile
                resident(w1_bf16),                                  # w1 (state_dim, 64)
                resident(b1),                                       # b1 (1, 64)
                resident(w2_bf16),                                  # w2 (64, 64)
                resident(b2),                                       # b2 (1, 64)
                resident(w3_row),                                   # w3 row (1, 64)
                pl.BlockSpec(memory_space=pltpu.MemorySpace.SMEM),  # b3 (1, 1) scalar
            ],
            out_specs=pl.BlockSpec((TB, 1), lambda i: (i, 0)),
        ),
        compiler_params=pltpu.CompilerParams(
            dimension_semantics=("parallel",),
        ),
        cost_estimate=pl.CostEstimate(
            flops=flops, transcendentals=0, bytes_accessed=bytes_accessed),
    )(x_bf16, w1_bf16, b1, w2_bf16, b2, w3_row, b3)


def init_params(key, state_dim):
    """Deterministic init mimicking PyTorch's default U(-1/sqrt(fan_in), +1/sqrt(fan_in))."""
    ks = jax.random.split(key, 6)

    def lin(kw, kb, fan_in, fan_out):
        bound = 1.0 / jnp.sqrt(float(fan_in))
        w = jax.random.uniform(kw, (fan_in, fan_out), jnp.float32, -bound, bound)
        b = jax.random.uniform(kb, (1, fan_out), jnp.float32, -bound, bound)
        return w, b

    w1, b1 = lin(ks[0], ks[1], state_dim, HIDDEN)
    w2, b2 = lin(ks[2], ks[3], HIDDEN, HIDDEN)
    w3, b3 = lin(ks[4], ks[5], HIDDEN, 1)
    return (w1, b1, w2, b2, w3, b3)


def reference_forward(states, params):
    w1, b1, w2, b2, w3, b3 = params
    h1 = jnp.maximum(states @ w1 + b1, 0.0)
    h2 = jnp.maximum(h1 @ w2 + b2, 0.0)
    return h2 @ w3 + b3


if __name__ == "__main__":
    key = jax.random.PRNGKey(0)
    k_param, k_x = jax.random.split(key)

    batch, state_dim = 256, 32
    params = init_params(k_param, state_dim)
    states = jax.random.normal(k_x, (batch, state_dim), jnp.float32)

    # tb=128 -> grid=(2,): exercises the batch-tiled, pipelined path on small shapes.
    out = value_model_forward(states, params, tb=128)
    out = jax.block_until_ready(out)

    ref = reference_forward(states, params)
    assert out.shape == (batch, 1), out.shape
    # Tolerance loosened vs the pure-f32 version because MXU inputs are bf16.
    max_err = float(jnp.max(jnp.abs(out - ref)))
    assert jnp.allclose(out, ref, atol=5e-2, rtol=5e-2), f"mismatch vs reference (max err {max_err})"

    print("KERNEL_OK")
</pallas_src>

<mosaic_0001>
module attributes {stable_mosaic.version = 11 : i64} {
  func.func @_value_mlp_kernel(%arg0: i32, %arg1: memref<128x32xbf16, #tpu.memory_space<vmem>>, %arg2: memref<32x64xbf16, #tpu.memory_space<vmem>>, %arg3: memref<1x64xf32, #tpu.memory_space<vmem>>, %arg4: memref<64x64xbf16, #tpu.memory_space<vmem>>, %arg5: memref<1x64xf32, #tpu.memory_space<vmem>>, %arg6: memref<1x64xf32, #tpu.memory_space<vmem>>, %arg7: memref<1x1xf32, #tpu.memory_space<smem>>, %arg8: memref<128x1xf32, #tpu.memory_space<vmem>>) attributes {dimension_semantics = [#tpu.dimension_semantics<parallel>], iteration_bounds = array<i64: 2>, scalar_prefetch = 0 : i64, scratch_operands = 0 : i64, tpu.core_type = #tpu.core_type<tc>, window_params = [{transform_indices = @transform_0, window_bounds = array<i64: 128, 32>}, {pipeline_mode = #tpu.pipeline_mode<synchronous>, transform_indices = @transform_1, window_bounds = array<i64: 32, 64>}, {pipeline_mode = #tpu.pipeline_mode<synchronous>, transform_indices = @transform_2, window_bounds = array<i64: 1, 64>}, {pipeline_mode = #tpu.pipeline_mode<synchronous>, transform_indices = @transform_3, window_bounds = array<i64: 64, 64>}, {pipeline_mode = #tpu.pipeline_mode<synchronous>, transform_indices = @transform_4, window_bounds = array<i64: 1, 64>}, {pipeline_mode = #tpu.pipeline_mode<synchronous>, transform_indices = @transform_5, window_bounds = array<i64: 1, 64>}, {transform_indices = @transform_6, window_bounds = array<i64: 1, 1>}, {transform_indices = @transform_7, window_bounds = array<i64: 128, 1>}]} {
    %c0 = arith.constant 0 : index
    %c0_0 = arith.constant 0 : index
    %0 = vector.load %arg1[%c0, %c0_0] : memref<128x32xbf16, #tpu.memory_space<vmem>>, vector<128x32xbf16>
    %c0_1 = arith.constant 0 : index
    %c0_2 = arith.constant 0 : index
    %1 = vector.load %arg2[%c0_1, %c0_2] : memref<32x64xbf16, #tpu.memory_space<vmem>>, vector<32x64xbf16>
    %cst = arith.constant dense<0.000000e+00> : vector<128x64xf32>
    %2 = tpu.matmul %0, %1, %cst {dimension_numbers = #tpu.dot_dimension_numbers<[1], [0], [0], [1], [0, 0, 1, 1], [], []>} : vector<128x32xbf16>, vector<32x64xbf16>, vector<128x64xf32> -> vector<128x64xf32>
    %c0_3 = arith.constant 0 : index
    %c0_4 = arith.constant 0 : index
    %3 = vector.load %arg3[%c0_3, %c0_4] : memref<1x64xf32, #tpu.memory_space<vmem>>, vector<1x64xf32>
    %4 = vector.broadcast %3 : vector<1x64xf32> to vector<128x64xf32>
    %5 = arith.addf %2, %4 : vector<128x64xf32>
    %cst_5 = arith.constant 0.000000e+00 : f32
    %6 = vector.broadcast %cst_5 : f32 to vector<128x64xf32>
    %7 = arith.maximumf %5, %6 : vector<128x64xf32>
    %8 = arith.truncf %7 : vector<128x64xf32> to vector<128x64xbf16>
    %c0_6 = arith.constant 0 : index
    %c0_7 = arith.constant 0 : index
    %9 = vector.load %arg4[%c0_6, %c0_7] : memref<64x64xbf16, #tpu.memory_space<vmem>>, vector<64x64xbf16>
    %cst_8 = arith.constant dense<0.000000e+00> : vector<128x64xf32>
    %10 = tpu.matmul %8, %9, %cst_8 {dimension_numbers = #tpu.dot_dimension_numbers<[1], [0], [0], [1], [0, 0, 1, 1], [], []>} : vector<128x64xbf16>, vector<64x64xbf16>, vector<128x64xf32> -> vector<128x64xf32>
    %c0_9 = arith.constant 0 : index
    %c0_10 = arith.constant 0 : index
    %11 = vector.load %arg5[%c0_9, %c0_10] : memref<1x64xf32, #tpu.memory_space<vmem>>, vector<1x64xf32>
    %12 = vector.broadcast %11 : vector<1x64xf32> to vector<128x64xf32>
    %13 = arith.addf %10, %12 : vector<128x64xf32>
    %cst_11 = arith.constant 0.000000e+00 : f32
    %14 = vector.broadcast %cst_11 : f32 to vector<128x64xf32>
    %15 = arith.maximumf %13, %14 : vector<128x64xf32>
    %c0_12 = arith.constant 0 : index
    %c0_13 = arith.constant 0 : index
    %16 = vector.load %arg6[%c0_12, %c0_13] : memref<1x64xf32, #tpu.memory_space<vmem>>, vector<1x64xf32>
    %17 = vector.broadcast %16 : vector<1x64xf32> to vector<128x64xf32>
    %18 = arith.mulf %15, %17 : vector<128x64xf32>
    %cst_14 = arith.constant dense<0.000000e+00> : vector<128xf32>
    %19 = vector.multi_reduction <add>, %18, %cst_14 [1] : vector<128x64xf32> to vector<128xf32>
    %20 = vector.shape_cast %19 : vector<128xf32> to vector<128x1xf32>
    %c0_15 = arith.constant 0 : index
    %c0_16 = arith.constant 0 : index
    %21 = memref.load %arg7[%c0_15, %c0_16] : memref<1x1xf32, #tpu.memory_space<smem>>
    %22 = vector.broadcast %21 : f32 to vector<128x1xf32>
    %23 = arith.addf %20, %22 : vector<128x1xf32>
    %c0_17 = arith.constant 0 : index
    %c0_18 = arith.constant 0 : index
    %24 = vector.load %arg8[%c0_17, %c0_18] : memref<128x1xf32, #tpu.memory_space<vmem>>, vector<128x1xf32>
    tpu.vector_store %arg8[%c0_17, %c0_18], %23 {strides = array<i32>} : memref<128x1xf32, #tpu.memory_space<vmem>>, vector<128x1xf32>,
    return
  }
  func.func @transform_0(%arg0: i32) -> (i32, i32) {
    %c0_i32 = arith.constant 0 : i32
    %c0_i32_0 = arith.constant 0 : i32
    return %arg0, %c0_i32 : i32, i32
  }
  func.func @transform_1(%arg0: i32) -> (i32, i32) {
    %c0_i32 = arith.constant 0 : i32
    %c0_i32_0 = arith.constant 0 : i32
    %c0_i32_1 = arith.constant 0 : i32
    return %c0_i32, %c0_i32_0 : i32, i32
  }
  func.func @transform_2(%arg0: i32) -> (i32, i32) {
    %c0_i32 = arith.constant 0 : i32
    %c0_i32_0 = arith.constant 0 : i32
    %c0_i32_1 = arith.constant 0 : i32
    return %c0_i32, %c0_i32_0 : i32, i32
  }
  func.func @transform_3(%arg0: i32) -> (i32, i32) {
    %c0_i32 = arith.constant 0 : i32
    %c0_i32_0 = arith.constant 0 : i32
    %c0_i32_1 = arith.constant 0 : i32
    return %c0_i32, %c0_i32_0 : i32, i32
  }
  func.func @transform_4(%arg0: i32) -> (i32, i32) {
    %c0_i32 = arith.constant 0 : i32
    %c0_i32_0 = arith.constant 0 : i32
    %c0_i32_1 = arith.constant 0 : i32
    return %c0_i32, %c0_i32_0 : i32, i32
  }
  func.func @transform_5(%arg0: i32) -> (i32, i32) {
    %c0_i32 = arith.constant 0 : i32
    %c0_i32_0 = arith.constant 0 : i32
    %c0_i32_1 = arith.constant 0 : i32
    return %c0_i32, %c0_i32_0 : i32, i32
  }
  func.func @transform_6(%arg0: i32) -> (i32, i32) {
    %c0_i32 = arith.constant 0 : i32
    %c0_i32_0 = arith.constant 0 : i32
    %c0_i32_1 = arith.constant 0 : i32
    return %c0_i32, %c0_i32_0 : i32, i32
  }
  func.func @transform_7(%arg0: i32) -> (i32, i32) {
    %c0_i32 = arith.constant 0 : i32
    %c0_i32_0 = arith.constant 0 : i32
    return %arg0, %c0_i32 : i32, i32
  }
}

</mosaic_0001>

<bundles_post_ra>
// kernel: tpu_custom_call.1
= control target key start
LH: loop header
LB: loop body
LE: loop exit
PB: predicated region body
PF: predicated region fallthrough
CT: control target
= control target key end

     0   :  { %s1031_s26 = smov 0   ;;  %s1181_s0 = inlined_call_operand.vmem [shape: bf16[256,32], index: 0, kind: input, shape index: {}]   ;;  %s1182_s1 = inlined_call_operand.vmem [shape: bf16[32,64], index: 1, kind: input, shape index: {}]   ;;  %s1183_s2 = inlined_call_operand.vmem [shape: f32[1,64], index: 2, kind: input, shape index: {}]   ;;  %s1184_s3 = inlined_call_operand.vmem [shape: bf16[64,64], index: 3, kind: input, shape index: {}]   ;;  %s1185_s4 = inlined_call_operand.vmem [shape: f32[1,64], index: 4, kind: input, shape index: {}]   ;;  %s1186_s5 = inlined_call_operand.vmem [shape: f32[1,64], index: 5, kind: input, shape index: {}]   ;;  %s1187_s6 = inlined_call_operand.<no memory space> [shape: f32[1,1], index: 6, kind: input, shape index: {}]   ;;  %s1188_s7 = inlined_call_operand.vmem [shape: f32[256,1], index: 7, kind: output, shape index: {}]  }
   0x1   :  { %12 = sst [smem:[#allocation2]] %s1187_s6 }
   0x2 LB: > { %s848_s27 = sadd.s32 4294967295, %s986_s26   ;;  %p852_p0 = scmp.ge.s32.totalorder %s986_s26, 1  ;;  %s986_s26 = sphi %s1031_s26, %s18_s26  }
   0x3   : > { %p239_p1 = scmp.lt.s32.totalorder %s986_s26, 3 }
   0x5   : > { %p240_p2 = pnand %p852_p0, %p239_p1 }
   0x6   : > { %s853_s6 = sshll.u32 (!%p240_p2), %s848_s27, 4  ;;  %s757_s28 = sld [smem:[#allocation2]] (!%p240_p2) }
   0x7   : > { %243 = sbr.rel (%p240_p2) target bundleno = 602 (0x25a), region = 48  ;;  %p272_p3 = scmp.lt.s32.totalorder (!%p240_p2), %s853_s6, 31 }
   0xc   : > { %v966_v0 = vld [vmem:[%s1182_s1 + $0x8] sm:$0xff]   ;;  %v967_v1 = vld [vmem:[%s1182_s1] sm:$0xff]   ;;  %v976_v2 = vld [vmem:[%s1184_s3 + $0x18] sm:$0xff]   ;;  %s1190_s6 = smov (!%p272_p3, %s853_s6), 31  ;;  %vm363_vm0 = vcmask 261120   ;;  %vm548_vm1 = vcmask 523264  }
   0xd   : > { %914 = vmatprep.subr.bf16.mxu0 %v966_v0  ;;  %934 = vmatprep.subr.bf16.mxu1 %v976_v2  ;;  %s854_s11 = sshll.u32 %s1190_s6, 2  ;;  %v977_v11 = vld [vmem:[%s1184_s3 + $0x10] sm:$0xff]   ;;  %v978_v12 = vld [vmem:[%s1184_s3 + $0x8] sm:$0xff]   ;;  %v979_v13 = vld [vmem:[%s1184_s3] sm:$0xff]   ;;  %s856_s29 = sshll.u32 %s1190_s6, 3  ;;  %vm775_vm2 = vcmask 7168  }
   0xe   : > { %915 = vmatpush3.bf16.msra.mxu0 %v966_v0  ;;  %935 = vmatpush3.bf16.msra.mxu1 %v976_v2  ;;  %s275_s14 = scalar_lea.vmem %s1181_s0, %s854_s11  ;;  %v857_v16 = vld [vmem:[%s1183_s2] ss:$0 sm:$0xff]  ;;  %s1144_s9 = scalar_lea.vmem %s1188_s7, %s856_s29 }
   0xf   : > { %916 = vmatprep.subr.bf16.mxu0 %v967_v1  ;;  %v968_v3 = vld [vmem:[%s275_s14] sm:$0xff]   ;;  %v969_v4 = vld [vmem:[%s275_s14 + $0x8] sm:$0xff]   ;;  %v970_v5 = vld [vmem:[%s275_s14 + $0x10] sm:$0xff]   ;;  %936 = vmatprep.subr.bf16.mxu1 %v977_v11 }
  0x10   : > { %918 = vmatprep.mubr.msk.bf16.mxu0 %vm363_vm0, %v968_v3  ;;  %v971_v6 = vld [vmem:[%s275_s14 + $0x18] sm:$0xff]   ;;  %v972_v7 = vld [vmem:[%s275_s14 + $0x20] sm:$0xff]   ;;  %v973_v8 = vld [vmem:[%s275_s14 + $0x28] sm:$0xff]  }
  0x11   : > { %v974_v9 = vld [vmem:[%s275_s14 + $0x30] sm:$0xff]   ;;  %v975_v10 = vld [vmem:[%s275_s14 + $0x38] sm:$0xff]  }
  0x12   : > { %917 = vmatpush3.bf16.msra.mxu0 %v967_v1  ;;  %937 = vmatpush3.bf16.msra.mxu1 %v977_v11  ;;  %v1091_v11 = vld [vmem:[%s1186_s5] ss:$0 sm:$0xff] }
  0x13   : > { %938 = vmatprep.subr.bf16.mxu1 %v978_v12 }
  0x15   : > { %919 = vmatmul.mubr.msk.bf16.vlgmr.msra.gmra.mxu0 %vm363_vm0, %v969_v4 }
  0x16   : > { %922 = vmatprep.mubr.msk.bf16.mxu0 %vm363_vm0, %v970_v5  ;;  %939 = vmatpush3.bf16.msra.mxu1 %v978_v12 }
  0x17   : > { %940 = vmatprep.subr.bf16.mxu1 %v979_v13 }
  0x1a   : > { %941 = vmatpush3.bf16.msra.mxu1 %v979_v13 }
  0x1d   : > { %923 = vmatmul.mubr.msk.bf16.gmra.mxu0 %vm363_vm0, %v971_v6 }
  0x1e   : > { %926 = vmatprep.mubr.msk.bf16.mxu0 %vm363_vm0, %v972_v7  ;;  %v1085_v7 = vld [vmem:[%s1185_s4] ss:$0 sm:$0xff] }
  0x25   : > { %927 = vmatmul.mubr.msk.bf16.gmra.mxu0 %vm363_vm0, %v973_v8 }
  0x26   : > { %930 = vmatprep.mubr.msk.bf16.mxu0 %vm363_vm0, %v974_v9 }
  0x2d   : > { %931 = vmatmul.mubr.msk.bf16.gmra.mxu0 %vm363_vm0, %v975_v10 }
  0xd5   : > { %v920_v14 = vpop.f32.mrf.mxu0 }
  0xd6   : > { %v431_v20 = vadd.f32 %v920_v14, %v857_v16 }
  0xd7   : > { %v422_v15 = vpop.f32.mrf.mxu0 }
  0xd8   : > { %v423_v18 = vadd.f32 %v857_v16, %v422_v15  ;;  %v487_v27 = vmax.f32 %v431_v20, 0.0 }
  0xd9   : > { %v921_v17 = vpop.f32.mrf.mxu0 }
  0xda   : > { %v434_v19 = vadd.f32 %v921_v17, %v857_v16  ;;  %v485_v25 = vmax.f32 %v423_v18, 0.0 }
  0xdb   : > { %v425_v21 = vpop.f32.mrf.mxu0 }
  0xdc   : > { %v426_v22 = vadd.f32 %v857_v16, %v425_v21  ;;  %v488_v23 = vmax.f32 %v434_v19, 0.0 }
  0xdd   : > { %v924_v24 = vpop.f32.mrf.mxu0 }
  0xde   : > { %v486_v26 = vmax.f32 %v426_v22, 0.0  ;;  %v502_v30 = vpack.c.bf16 %v488_v23, %v487_v27  ;;  %v447_v34 = vadd.f32 %v924_v24, %v857_v16 }
  0xdf   : > { %v438_v28 = vpop.f32.mrf.mxu0 }
  0xe0   : > { %v501_v29 = vpack.c.bf16 %v486_v26, %v485_v25  ;;  %v439_v32 = vadd.f32 %v857_v16, %v438_v28  ;;  %v491_v41 = vmax.f32 %v447_v34, 0.0 }
  0xe1   : > { %v925_v31 = vpop.f32.mrf.mxu0 }
  0xe2   : > { %v450_v33 = vadd.f32 %v925_v31, %v857_v16  ;;  %942 = vmatprep.mubr.msk.bf16.mxu1 %vm548_vm1, %v501_v29  ;;  %v489_v39 = vmax.f32 %v439_v32, 0.0 }
  0xe3   : > { %v441_v35 = vpop.f32.mrf.mxu0  ;;  %943 = vmatmul.mubr.msk.bf16.vlgmr.msra.gmra.mxu1 %vm548_vm1, %v502_v30 }
  0xe4   : > { %v442_v36 = vadd.f32 %v857_v16, %v441_v35  ;;  %v492_v37 = vmax.f32 %v450_v33, 0.0 }
  0xe5   : > { %v928_v38 = vpop.f32.mrf.mxu0 }
  0xe6   : > { %v490_v40 = vmax.f32 %v442_v36, 0.0  ;;  %v504_v44 = vpack.c.bf16 %v492_v37, %v491_v41  ;;  %v463_v48 = vadd.f32 %v928_v38, %v857_v16 }
  0xe7   : > { %v454_v42 = vpop.f32.mrf.mxu0 }
  0xe8   : > { %v503_v43 = vpack.c.bf16 %v490_v40, %v489_v39  ;;  %v455_v46 = vadd.f32 %v857_v16, %v454_v42  ;;  %v495_v55 = vmax.f32 %v463_v48, 0.0 }
  0xe9   : > { %v929_v45 = vpop.f32.mrf.mxu0 }
  0xea   : > { %v466_v47 = vadd.f32 %v929_v45, %v857_v16  ;;  %946 = vmatprep.mubr.msk.bf16.mxu1 %vm548_vm1, %v503_v43  ;;  %v493_v53 = vmax.f32 %v455_v46, 0.0 }
  0xeb   : > { %v457_v49 = vpop.f32.mrf.mxu0  ;;  %947 = vmatmul.mubr.msk.bf16.gmra.mxu1 %vm548_vm1, %v504_v44 }
  0xec   : > { %v458_v50 = vadd.f32 %v857_v16, %v457_v49  ;;  %v496_v51 = vmax.f32 %v466_v47, 0.0 }
  0xed   : > { %v932_v52 = vpop.f32.mrf.mxu0 }
  0xee   : > { %v494_v54 = vmax.f32 %v458_v50, 0.0  ;;  %v506_v58 = vpack.c.bf16 %v496_v51, %v495_v55  ;;  %v479_v62 = vadd.f32 %v932_v52, %v857_v16 }
  0xef   : > { %v470_v56 = vpop.f32.mrf.mxu0 }
  0xf0   : > { %v505_v57 = vpack.c.bf16 %v494_v54, %v493_v53  ;;  %v471_v60 = vadd.f32 %v857_v16, %v470_v56  ;;  %v499_v4 = vmax.f32 %v479_v62, 0.0 }
  0xf1   : > { %v933_v59 = vpop.f32.mrf.mxu0 }
  0xf2   : > { %v482_v61 = vadd.f32 %v933_v59, %v857_v16  ;;  %950 = vmatprep.mubr.msk.bf16.mxu1 %vm548_vm1, %v505_v57  ;;  %v497_v2 = vmax.f32 %v471_v60, 0.0 }
  0xf3   : > { %v473_v63 = vpop.f32.mrf.mxu0  ;;  %951 = vmatmul.mubr.msk.bf16.gmra.mxu1 %vm548_vm1, %v506_v58 }
  0xf4   : > { %v474_v0 = vadd.f32 %v857_v16, %v473_v63  ;;  %v500_v1 = vmax.f32 %v482_v61, 0.0 }
  0xf6   : > { %v498_v3 = vmax.f32 %v474_v0, 0.0  ;;  %v508_v6 = vpack.c.bf16 %v500_v1, %v499_v4 }
  0xf8   : > { %v507_v5 = vpack.c.bf16 %v498_v3, %v497_v2 }
  0xfa   : > { %954 = vmatprep.mubr.msk.bf16.mxu1 %vm548_vm1, %v507_v5 }
  0xfb   : > { %955 = vmatmul.mubr.msk.bf16.gmra.mxu1 %vm548_vm1, %v508_v6 }
 0x1a3   : > { %v944_v8 = vpop.f32.mrf.mxu1 }
 0x1a4   : > { %v616_v9 = vadd.f32 %v944_v8, %v1085_v7 }
 0x1a5   : > { %v607_v10 = vpop.f32.mrf.mxu1 }
 0x1a6   : > { %v672_v12 = vmax.f32 %v616_v9, 0.0  ;;  %v608_v13 = vadd.f32 %v1085_v7, %v607_v10 }
 0x1a7   : > { %v945_v14 = vpop.f32.mrf.mxu1 }
 0x1a8   : > { %v670_v15 = vmax.f32 %v608_v13, 0.0  ;;  %v619_v16 = vadd.f32 %v945_v14, %v1085_v7  ;;  %v695_v17 = vmul.f32 %v1091_v11, %v672_v12 }
 0x1a9   : > { %v610_v18 = vpop.f32.mrf.mxu1 }
 0x1aa   : > { %v673_v19 = vmax.f32 %v619_v16, 0.0  ;;  %v611_v20 = vadd.f32 %v1085_v7, %v610_v18  ;;  %v715_v21 = vsel %vm548_vm1, %v695_v17, 0.0  ;;  %v693_v22 = vmul.f32 %v1091_v11, %v670_v15 }
 0x1ab   : > { %716 = vadd.xlane.f32.xlu1 %v715_v21  ;;  %v948_v23 = vpop.f32.mrf.mxu1 }
 0x1ac   : > { %v671_v24 = vmax.f32 %v611_v20, 0.0  ;;  %v632_v25 = vadd.f32 %v948_v23, %v1085_v7  ;;  %v709_v26 = vsel %vm548_vm1, %v693_v22, 0.0  ;;  %v696_v27 = vmul.f32 %v1091_v11, %v673_v19 }
 0x1ad   : > { %v623_v28 = vpop.f32.mrf.mxu1  ;;  %710 = vadd.xlane.f32.xlu0 %v709_v26  ;;  %v758_v26 = vstv %s757_s28 }
 0x1ae   : > { %v676_v29 = vmax.f32 %v632_v25, 0.0  ;;  %v624_v30 = vadd.f32 %v1085_v7, %v623_v28  ;;  %v718_v31 = vsel %vm548_vm1, %v696_v27, 0.0  ;;  %v694_v32 = vmul.f32 %v1091_v11, %v671_v24 }
 0x1af   : > { %719 = vadd.xlane.f32.xlu1 %v718_v31  ;;  %v949_v33 = vpop.f32.mrf.mxu1 }
 0x1b0   : > { %v674_v34 = vmax.f32 %v624_v30, 0.0  ;;  %v635_v35 = vadd.f32 %v949_v33, %v1085_v7  ;;  %v712_v36 = vsel %vm548_vm1, %v694_v32, 0.0  ;;  %v699_v37 = vmul.f32 %v1091_v11, %v676_v29 }
 0x1b1   : > { %v626_v38 = vpop.f32.mrf.mxu1  ;;  %713 = vadd.xlane.f32.xlu0 %v712_v36 }
 0x1b2   : > { %v677_v39 = vmax.f32 %v635_v35, 0.0  ;;  %v627_v40 = vadd.f32 %v1085_v7, %v626_v38  ;;  %v727_v42 = vsel %vm548_vm1, %v699_v37, 0.0  ;;  %v697_v46 = vmul.f32 %v1091_v11, %v674_v34 }
 0x1b3   : > { %v952_v41 = vpop.f32.mrf.mxu1 }
 0x1b4   : > { %v675_v43 = vmax.f32 %v627_v40, 0.0  ;;  %v648_v44 = vadd.f32 %v952_v41, %v1085_v7  ;;  %v700_v45 = vmul.f32 %v1091_v11, %v677_v39  ;;  %v721_v55 = vsel %vm548_vm1, %v697_v46, 0.0 }
 0x1b5   : > { %v639_v47 = vpop.f32.mrf.mxu1  ;;  %728 = vadd.xlane.f32.xlu0 %v727_v42 }
 0x1b6   : > { %v680_v48 = vmax.f32 %v648_v44, 0.0  ;;  %v640_v49 = vadd.f32 %v1085_v7, %v639_v47  ;;  %v730_v50 = vsel %vm548_vm1, %v700_v45, 0.0  ;;  %v698_v51 = vmul.f32 %v1091_v11, %v675_v43 }
 0x1b7   : > { %731 = vadd.xlane.f32.xlu1 %v730_v50  ;;  %v953_v52 = vpop.f32.mrf.mxu1 }
 0x1b8   : > { %v678_v53 = vmax.f32 %v640_v49, 0.0  ;;  %v651_v54 = vadd.f32 %v953_v52, %v1085_v7  ;;  %v703_v56 = vmul.f32 %v1091_v11, %v680_v48  ;;  %v724_v60 = vsel %vm548_vm1, %v698_v51, 0.0 }
 0x1b9   : > { %v642_v57 = vpop.f32.mrf.mxu1  ;;  %722 = vadd.xlane.f32.xlu0 %v721_v55 }
 0x1ba   : > { %v681_v58 = vmax.f32 %v651_v54, 0.0  ;;  %v643_v59 = vadd.f32 %v1085_v7, %v642_v57  ;;  %v739_v62 = vsel %vm548_vm1, %v703_v56, 0.0  ;;  %v701_v2 = vmul.f32 %v1091_v11, %v678_v53 }
 0x1bb   : > { %v956_v61 = vpop.f32.mrf.mxu1  ;;  %725 = vadd.xlane.f32.xlu1 %v724_v60 }
 0x1bc   : > { %v679_v63 = vmax.f32 %v643_v59, 0.0  ;;  %v664_v0 = vadd.f32 %v956_v61, %v1085_v7  ;;  %v704_v1 = vmul.f32 %v1091_v11, %v681_v58  ;;  %v733_v13 = vsel %vm548_vm1, %v701_v2, 0.0 }
 0x1bd   : > { %v655_v3 = vpop.f32.mrf.mxu1  ;;  %740 = vadd.xlane.f32.xlu0 %v739_v62 }
 0x1be   : > { %v656_v4 = vadd.f32 %v1085_v7, %v655_v3  ;;  %v742_v5 = vsel %vm548_vm1, %v704_v1, 0.0  ;;  %v702_v6 = vmul.f32 %v1091_v11, %v679_v63  ;;  %v684_v9 = vmax.f32 %v664_v0, 0.0 }
 0x1bf   : > { %v957_v8 = vpop.f32.mrf.mxu1  ;;  %743 = vadd.xlane.f32.xlu1 %v742_v5 }
 0x1c0   : > { %v682_v10 = vmax.f32 %v656_v4, 0.0  ;;  %v667_v12 = vadd.f32 %v957_v8, %v1085_v7  ;;  %v736_v16 = vsel %vm548_vm1, %v702_v6, 0.0  ;;  %v707_v21 = vmul.f32 %v1091_v11, %v684_v9 }
 0x1c1   : > { %v658_v14 = vpop.f32.mrf.mxu1  ;;  %734 = vadd.xlane.f32.xlu0 %v733_v13 }
 0x1c2   : > { %v659_v15 = vadd.f32 %v1085_v7, %v658_v14  ;;  %v705_v17 = vmul.f32 %v1091_v11, %v682_v10  ;;  %v685_v18 = vmax.f32 %v667_v12, 0.0  ;;  %v751_v24 = vsel %vm548_vm1, %v707_v21, 0.0 }
 0x1c3   : > { %737 = vadd.xlane.f32.xlu1 %v736_v16 }
 0x1c4   : > { %v683_v19 = vmax.f32 %v659_v15, 0.0  ;;  %v745_v20 = vsel %vm548_vm1, %v705_v17, 0.0  ;;  %v708_v7 = vmul.f32 %v1091_v11, %v685_v18 }
 0x1c5   : > { %746 = vadd.xlane.f32.xlu0 %v745_v20 }
 0x1c6   : > { %v706_v22 = vmul.f32 %v1091_v11, %v683_v19  ;;  %v754_v25 = vsel %vm548_vm1, %v708_v7, 0.0 }
 0x1c8   : > { %v748_v23 = vsel %vm548_vm1, %v706_v22, 0.0 }
 0x1c9   : > { %749 = vadd.xlane.f32.xlu1 %v748_v23  ;;  %752 = vadd.xlane.f32.xlu0 %v751_v24 }
 0x1cd   : > { %755 = vadd.xlane.f32.xlu1 %v754_v25 }
 0x234   : > { %v717_v11 = vpop.xlane.xlu1 %716 }
 0x235   : > { %v761_v27 = vadd.f32 %v758_v26, %v717_v11 }
 0x236   : > { %v711_v28 = vpop.xlane.xlu0 %710 }
 0x237   : > { %778 = vst.msk [vmem:[%s1144_s9 + $0x10] sm:$0xff] %vm775_vm2, %v761_v27  ;;  %v759_v29 = vadd.f32 %v758_v26, %v711_v28 }
 0x238   : > { %v720_v30 = vpop.xlane.xlu1 %719 }
 0x239   : > { %776 = vst.msk [vmem:[%s1144_s9] sm:$0xff] %vm775_vm2, %v759_v29  ;;  %v762_v31 = vadd.f32 %v758_v26, %v720_v30 }
 0x23a   : > { %v714_v32 = vpop.xlane.xlu0 %713 }
 0x23b   : > { %779 = vst.msk [vmem:[%s1144_s9 + $0x18] sm:$0xff] %vm775_vm2, %v762_v31  ;;  %v760_v33 = vadd.f32 %v758_v26, %v714_v32 }
 0x23d   : > { %777 = vst.msk [vmem:[%s1144_s9 + $0x8] sm:$0xff] %vm775_vm2, %v760_v33 }
 0x23e   : > { %v729_v34 = vpop.xlane.xlu0 %728 }
 0x23f   : > { %v765_v35 = vadd.f32 %v758_v26, %v729_v34 }
 0x240   : > { %v732_v36 = vpop.xlane.xlu1 %731 }
 0x241   : > { %782 = vst.msk [vmem:[%s1144_s9 + $0x30] sm:$0xff] %vm775_vm2, %v765_v35  ;;  %v766_v37 = vadd.f32 %v758_v26, %v732_v36 }
 0x242   : > { %v723_v38 = vpop.xlane.xlu0 %722 }
 0x243   : > { %783 = vst.msk [vmem:[%s1144_s9 + $0x38] sm:$0xff] %vm775_vm2, %v766_v37  ;;  %v763_v39 = vadd.f32 %v758_v26, %v723_v38 }
 0x244   : > { %v726_v40 = vpop.xlane.xlu1 %725 }
 0x245   : > { %780 = vst.msk [vmem:[%s1144_s9 + $0x20] sm:$0xff] %vm775_vm2, %v763_v39  ;;  %v764_v41 = vadd.f32 %v758_v26, %v726_v40 }
 0x246   : > { %v741_v42 = vpop.xlane.xlu0 %740 }
 0x247   : > { %781 = vst.msk [vmem:[%s1144_s9 + $0x28] sm:$0xff] %vm775_vm2, %v764_v41  ;;  %v769_v43 = vadd.f32 %v758_v26, %v741_v42 }
 0x248   : > { %v744_v44 = vpop.xlane.xlu1 %743 }
 0x249   : > { %786 = vst.msk [vmem:[%s1144_s9 + $0x50] sm:$0xff] %vm775_vm2, %v769_v43  ;;  %v770_v45 = vadd.f32 %v758_v26, %v744_v44 }
 0x24a   : > { %v735_v46 = vpop.xlane.xlu0 %734 }
 0x24b   : > { %787 = vst.msk [vmem:[%s1144_s9 + $0x58] sm:$0xff] %vm775_vm2, %v770_v45  ;;  %v767_v47 = vadd.f32 %v758_v26, %v735_v46 }
 0x24c   : > { %v738_v48 = vpop.xlane.xlu1 %737 }
 0x24d   : > { %784 = vst.msk [vmem:[%s1144_s9 + $0x40] sm:$0xff] %vm775_vm2, %v767_v47  ;;  %v768_v49 = vadd.f32 %v758_v26, %v738_v48 }
 0x24e   : > { %v747_v50 = vpop.xlane.xlu0 %746 }
 0x24f   : > { %785 = vst.msk [vmem:[%s1144_s9 + $0x48] sm:$0xff] %vm775_vm2, %v768_v49  ;;  %v771_v51 = vadd.f32 %v758_v26, %v747_v50 }
 0x251   : > { %788 = vst.msk [vmem:[%s1144_s9 + $0x60] sm:$0xff] %vm775_vm2, %v771_v51 }
 0x252   : > { %v750_v52 = vpop.xlane.xlu1 %749  ;;  %v753_v53 = vpop.xlane.xlu0 %752 }
 0x253   : > { %v772_v54 = vadd.f32 %v758_v26, %v750_v52  ;;  %v773_v55 = vadd.f32 %v758_v26, %v753_v53 }
 0x255   : > { %789 = vst.msk [vmem:[%s1144_s9 + $0x68] sm:$0xff] %vm775_vm2, %v772_v54  ;;  %790 = vst.msk [vmem:[%s1144_s9 + $0x70] sm:$0xff] %vm775_vm2, %v773_v55 }
 0x256   : > { %v756_v56 = vpop.xlane.xlu1 %755 }
 0x257   : > { %v774_v57 = vadd.f32 %v758_v26, %v756_v56 }
 0x259   : > { %791 = vst.msk [vmem:[%s1144_s9 + $0x78] sm:$0xff] %vm775_vm2, %v774_v57 }
 0x25a PF: > { %s18_s26 = sadd.s32 1, %s986_s26  }
 0x25b   : > { %p15_p4 = scmp.ge.s32.totalorder %s18_s26, 4  }
 0x25d   :  { %17 = sbr.rel (!%p15_p4) target bundleno = 2 (0x2), region = 78 }

</bundles_post_ra>
